<compile_context>
chip_gen: v5e
topology: v5e:2x2
jax: 0.10.0
libtpu: 0.0.40
codegen_flags: <defaults>
</compile_context>

<pallas_src>
import jax
import jax.numpy as jnp
from jax.experimental import pallas as pl
from jax.experimental.pallas import tpu as pltpu


def linear_kernel(x_ref, w_ref, b_ref, o_ref):
    # x: (TB, K) f32   w: (K, N) f32 (pre-transposed once at init)
    # b: (1, N) f32    o: (TB, N) f32
    y = jnp.dot(
        x_ref[...], w_ref[...],
        preferred_element_type=jnp.float32,
        precision=jax.lax.Precision.HIGHEST,   # full f32 matmul; cost irrelevant at K=120,N=10
    )
    o_ref[...] = (y + b_ref[...]).astype(o_ref.dtype)


def prepack_fc_params(weight, bias):
    """One-time packing of nn.Linear params (do this at model init, not per call).

    weight: (out_dim, in_dim) -> (in_dim, out_dim) f32
    bias:   (out_dim,)        -> (1, out_dim)     f32
    """
    w_t = jnp.asarray(weight, jnp.float32).T
    b2 = jnp.asarray(bias, jnp.float32).reshape(1, -1)
    return w_t, b2


def simple_cnn2_classifier(x, w_t, b2, *, tb_max=2048,
                           small_batch_bypass=True, min_pallas_batch=256):
    """Forward of SimpleCNN2Classifier: x @ W^T + b.

    x:   (B, in_dim) float32
    w_t: (in_dim, out_dim) float32   (pre-packed, see prepack_fc_params)
    b2:  (1, out_dim) float32        (pre-packed)
    """
    B, in_dim = x.shape
    out_dim = w_t.shape[1]

    # Tiny batches: pallas_call launch + one grid step dominate; let XLA fuse it.
    if small_batch_bypass and B < min_pallas_batch:
        y = jnp.dot(x.astype(jnp.float32), w_t,
                    precision=jax.lax.Precision.HIGHEST) + b2
        return y.astype(x.dtype)

    def rup(v, m):
        return (v + m - 1) // m * m

    B_pad = rup(B, 8)                      # sublane alignment only; no padding to tile size
    if B_pad <= 512:
        TB = B_pad                         # single tile
    elif B_pad <= 2 * tb_max:
        TB = rup(pl.cdiv(B_pad, 2), 8)     # exactly 2 tiles: v7x can use both TensorCores
    else:
        TB = tb_max
    grid = (pl.cdiv(B_pad, TB),)           # ragged last tile is masked by Pallas

    x_p = x if B_pad == B else jnp.pad(x, ((0, B_pad - B), (0, 0)))
    x_p = x_p.astype(jnp.float32)

    out = pl.pallas_call(
        linear_kernel,
        out_shape=jax.ShapeDtypeStruct((B_pad, out_dim), jnp.float32),
        grid_spec=pl.GridSpec(
            grid=grid,
            in_specs=[
                pl.BlockSpec((TB, in_dim), lambda i: (i, 0)),       # x streams over batch
                pl.BlockSpec((in_dim, out_dim), lambda i: (0, 0)),  # weight stays resident
                pl.BlockSpec((1, out_dim), lambda i: (0, 0)),       # bias stays resident
            ],
            out_specs=pl.BlockSpec((TB, out_dim), lambda i: (i, 0)),
        ),
        compiler_params=pltpu.CompilerParams(
            dimension_semantics=("parallel",),   # batch tiles independent (v7x: 2 TCs)
        ),
    )(x_p, w_t, b2)

    if B_pad != B:
        out = out[:B]
    return out.astype(x.dtype)


if __name__ == "__main__":
    import numpy as np

    in_dim, out_dim = 120, 10

    key = jax.random.PRNGKey(0)
    kx, kw, kb, kx2 = jax.random.split(key, 4)

    # Deterministic synthetic parameters (shapes match nn.Linear(120, 10)).
    bound = 1.0 / (in_dim ** 0.5)
    weight = jax.random.uniform(kw, (out_dim, in_dim), jnp.float32, -bound, bound)
    bias = jax.random.uniform(kb, (out_dim,), jnp.float32, -bound, bound)
    w_t, b2 = prepack_fc_params(weight, bias)   # one-time param packing

    weight_np = np.asarray(weight)
    bias_np = np.asarray(bias)

    # 1) Small batch, forced through the Pallas kernel (single tile).
    x = jax.random.normal(kx, (8, in_dim), jnp.float32)
    y = simple_cnn2_classifier(x, w_t, b2, small_batch_bypass=False)
    jax.block_until_ready(y)
    y_ref = np.asarray(x) @ weight_np.T + bias_np
    assert y.shape == (8, out_dim)
    assert np.allclose(np.asarray(y), y_ref, atol=2e-3, rtol=2e-3)

    # 2) Ragged batch > 512: exercises cdiv grid, 2-tile split (v7x) and masked tail block.
    x2 = jax.random.normal(kx2, (530, in_dim), jnp.float32)
    y2 = simple_cnn2_classifier(x2, w_t, b2)
    jax.block_until_ready(y2)
    y2_ref = np.asarray(x2) @ weight_np.T + bias_np
    assert y2.shape == (530, out_dim)
    assert np.allclose(np.asarray(y2), y2_ref, atol=2e-3, rtol=2e-3)

    # 3) Default dispatch at tiny batch takes the fused-XLA bypass (same semantics).
    y3 = simple_cnn2_classifier(x, w_t, b2)
    jax.block_until_ready(y3)
    assert np.allclose(np.asarray(y3), y_ref, atol=2e-3, rtol=2e-3)

    print("KERNEL_OK")
</pallas_src>

<mosaic_0001>
module attributes {stable_mosaic.version = 11 : i64} {
  func.func @linear_kernel(%arg0: i32, %arg1: memref<8x120xf32, #tpu.memory_space<vmem>>, %arg2: memref<120x10xf32, #tpu.memory_space<vmem>>, %arg3: memref<1x10xf32, #tpu.memory_space<vmem>>, %arg4: memref<8x10xf32, #tpu.memory_space<vmem>>) attributes {dimension_semantics = [#tpu.dimension_semantics<parallel>], iteration_bounds = array<i64: 1>, scalar_prefetch = 0 : i64, scratch_operands = 0 : i64, tpu.core_type = #tpu.core_type<tc>, window_params = [{transform_indices = @transform_0, window_bounds = array<i64: 8, 120>}, {pipeline_mode = #tpu.pipeline_mode<synchronous>, transform_indices = @transform_1, window_bounds = array<i64: 120, 10>}, {pipeline_mode = #tpu.pipeline_mode<synchronous>, transform_indices = @transform_2, window_bounds = array<i64: 1, 10>}, {transform_indices = @transform_3, window_bounds = array<i64: 8, 10>}]} {
    %c0 = arith.constant 0 : index
    %c0_0 = arith.constant 0 : index
    %0 = vector.load %arg1[%c0, %c0_0] : memref<8x120xf32, #tpu.memory_space<vmem>>, vector<8x120xf32>
    %c0_1 = arith.constant 0 : index
    %c0_2 = arith.constant 0 : index
    %1 = vector.load %arg2[%c0_1, %c0_2] : memref<120x10xf32, #tpu.memory_space<vmem>>, vector<120x10xf32>
    %cst = arith.constant dense<0.000000e+00> : vector<8x10xf32>
    %2 = tpu.matmul %0, %1, %cst {dimension_numbers = #tpu.dot_dimension_numbers<[1], [0], [0], [1], [0, 0, 1, 1], [], []>, precision = #tpu.contract_precision<fp32>} : vector<8x120xf32>, vector<120x10xf32>, vector<8x10xf32> -> vector<8x10xf32>
    %c0_3 = arith.constant 0 : index
    %c0_4 = arith.constant 0 : index
    %3 = vector.load %arg3[%c0_3, %c0_4] : memref<1x10xf32, #tpu.memory_space<vmem>>, vector<1x10xf32>
    %4 = vector.broadcast %3 : vector<1x10xf32> to vector<8x10xf32>
    %5 = arith.addf %2, %4 : vector<8x10xf32>
    %c0_5 = arith.constant 0 : index
    %c0_6 = arith.constant 0 : index
    %6 = vector.load %arg4[%c0_5, %c0_6] : memref<8x10xf32, #tpu.memory_space<vmem>>, vector<8x10xf32>
    tpu.vector_store %arg4[%c0_5, %c0_6], %5 {strides = array<i32>} : memref<8x10xf32, #tpu.memory_space<vmem>>, vector<8x10xf32>,
    return
  }
  func.func @transform_0(%arg0: i32) -> (i32, i32) {
    %c0_i32 = arith.constant 0 : i32
    %c0_i32_0 = arith.constant 0 : i32
    return %arg0, %c0_i32 : i32, i32
  }
  func.func @transform_1(%arg0: i32) -> (i32, i32) {
    %c0_i32 = arith.constant 0 : i32
    %c0_i32_0 = arith.constant 0 : i32
    %c0_i32_1 = arith.constant 0 : i32
    return %c0_i32, %c0_i32_0 : i32, i32
  }
  func.func @transform_2(%arg0: i32) -> (i32, i32) {
    %c0_i32 = arith.constant 0 : i32
    %c0_i32_0 = arith.constant 0 : i32
    %c0_i32_1 = arith.constant 0 : i32
    return %c0_i32, %c0_i32_0 : i32, i32
  }
  func.func @transform_3(%arg0: i32) -> (i32, i32) {
    %c0_i32 = arith.constant 0 : i32
    %c0_i32_0 = arith.constant 0 : i32
    return %arg0, %c0_i32 : i32, i32
  }
}

</mosaic_0001>

<bundles_post_ra>
// kernel: tpu_custom_call.1
= control target key start
LH: loop header
LB: loop body
LE: loop exit
PB: predicated region body
PF: predicated region fallthrough
CT: control target
= control target key end

     0   :  { %s711_s0 = inlined_call_operand.vmem [shape: f32[8,120], index: 0, kind: input, shape index: {}]   ;;  %s712_s1 = inlined_call_operand.vmem [shape: f32[120,10], index: 1, kind: input, shape index: {}]   ;;  %s713_s2 = inlined_call_operand.vmem [shape: f32[1,10], index: 2, kind: input, shape index: {}]   ;;  %s714_s3 = inlined_call_operand.hbm [shape: f32[8,10], index: 3, kind: output, shape index: {}]  }
   0x1   :  { %v30_v0 = vld [vmem:[%s712_s1 + $0x70] sm:$0xff]  ;;  %v29_v1 = vld [vmem:[%s712_s1 + $0x68] sm:$0xff]  ;;  %v28_v2 = vld [vmem:[%s712_s1 + $0x60] sm:$0xff] }
   0x2   :  { %v443_v3 = vand.u32 4294901760, %v30_v0  ;;  %v445_v4 = vand.u32 4294901760, %v29_v1  ;;  %v447_v5 = vand.u32 4294901760, %v28_v2  ;;  %v27_v6 = vld [vmem:[%s712_s1 + $0x58] sm:$0xff]  ;;  %v26_v7 = vld [vmem:[%s712_s1 + $0x50] sm:$0xff]  ;;  %v25_v8 = vld [vmem:[%s712_s1 + $0x48] sm:$0xff] }
   0x3   :  { %v458_v9 = vand.u32 4294901760, %v27_v6  ;;  %v460_v10 = vand.u32 4294901760, %v26_v7  ;;  %v462_v11 = vand.u32 4294901760, %v25_v8  ;;  %v24_v12 = vld [vmem:[%s712_s1 + $0x40] sm:$0xff]  ;;  %v23_v13 = vld [vmem:[%s712_s1 + $0x38] sm:$0xff]  ;;  %v22_v21 = vld [vmem:[%s712_s1 + $0x30] sm:$0xff] }
   0x4   :  { %41 = vmatpush.msra.mxu0 %v443_v3  ;;  %v472_v14 = vsub.f32 %v30_v0, %v443_v3  ;;  %v475_v15 = vsub.f32 %v29_v1, %v445_v4  ;;  %v478_v16 = vsub.f32 %v28_v2, %v447_v5  ;;  %v480_v17 = vand.u32 4294901760, %v24_v12  ;;  %229 = vmatpush.msra.mxu3 %v443_v3 }
   0x5   :  { %v484_v18 = vsub.f32 %v27_v6, %v458_v9  ;;  %v487_v19 = vsub.f32 %v26_v7, %v460_v10  ;;  %v489_v20 = vand.u32 4294901760, %v23_v13  ;;  %v499_v25 = vsub.f32 %v25_v8, %v462_v11 }
   0x6   :  { %43 = vmatpush.msra.mxu0 %v445_v4  ;;  %v82_v22 = vand.u32 4294901760, %v472_v14  ;;  %v88_v23 = vand.u32 4294901760, %v475_v15  ;;  %v94_v24 = vand.u32 4294901760, %v478_v16  ;;  %178 = vmatpush.msra.mxu2 %v472_v14  ;;  %v505_v28 = vsub.f32 %v24_v12, %v480_v17 }
   0x7   :  { %v100_v26 = vand.u32 4294901760, %v484_v18  ;;  %v106_v27 = vand.u32 4294901760, %v487_v19  ;;  %231 = vmatpush.msra.mxu3 %v445_v4 }
   0x8   :  { %8 = vsyncpa [#allocation3], 0  ;;  %v83_v29 = vsub.f32 %v472_v14, %v82_v22  ;;  %45 = vmatpush.msra.mxu0 %v447_v5  ;;  %v89_v30 = vsub.f32 %v475_v15, %v88_v23  ;;  %v95_v31 = vsub.f32 %v478_v16, %v94_v24  ;;  %v518_v32 = vand.u32 4294901760, %v22_v21  ;;  %181 = vmatpush.msra.mxu2 %v475_v15  ;;  %v21_v34 = vld [vmem:[%s712_s1 + $0x28] sm:$0xff]  ;;  %v20_v35 = vld [vmem:[%s712_s1 + $0x20] sm:$0xff]  ;;  %s413_s17 = smov [#allocation2]  }
   0x9   :  { %v522_v33 = vsub.f32 %v23_v13, %v489_v20  ;;  %233 = vmatpush.msra.mxu3 %v447_v5  ;;  %v101_v38 = vsub.f32 %v484_v18, %v100_v26  ;;  %v112_v39 = vand.u32 4294901760, %v499_v25  ;;  %v107_v40 = vsub.f32 %v487_v19, %v106_v27  ;;  %v19_v42 = vld [vmem:[%s712_s1 + $0x18] sm:$0xff]  ;;  %v18_v48 = vld [vmem:[%s712_s1 + $0x10] sm:$0xff]  ;;  %v17_v54 = vld [vmem:[%s712_s1 + $0x8] sm:$0xff]  ;;  %s374_s18 = sshll.u32 %s413_s17, 4  ;;  %s376_s21 = sshll.u32 %s714_s3, 4  ;;  %s375_s18 = int_to_ptr.vmem [resolvable:$true] %s374_s18  ;;  %s377_s21 = int_to_ptr.hbm [resolvable:$true] %s376_s21 }
   0xa   :  { %v84_v36 = vand.u32 4294901760, %v83_v29  ;;  %v90_v37 = vand.u32 4294901760, %v89_v30  ;;  %47 = vmatpush.msra.mxu0 %v458_v9  ;;  %184 = vmatpush.msra.mxu2 %v478_v16  ;;  %v118_v41 = vand.u32 4294901760, %v505_v28  ;;  %v96_v43 = vand.u32 4294901760, %v95_v31  ;;  %v16_v59 = vld [vmem:[%s712_s1] sm:$0xff] }
   0xb   :  { %235 = vmatpush.msra.mxu3 %v458_v9  ;;  %v546_v44 = vand.u32 4294901760, %v21_v34  ;;  %v549_v45 = vsub.f32 %v22_v21, %v518_v32  ;;  %v551_v46 = vand.u32 4294901760, %v20_v35  ;;  %v124_v47 = vand.u32 4294901760, %v522_v33  ;;  %v15_v60 = vld [vmem:[%s711_s0] sm:$0xff] }
   0xc   :  { %85 = vmatpush.msra.mxu1 %v84_v36  ;;  %49 = vmatpush.msra.mxu0 %v460_v10  ;;  %v102_v49 = vand.u32 4294901760, %v101_v38  ;;  %v113_v50 = vsub.f32 %v499_v25, %v112_v39  ;;  %v566_v52 = vand.u32 4294901760, %v19_v42  ;;  %v119_v53 = vsub.f32 %v505_v28, %v118_v41 }
   0xd   :  { %187 = vmatpush.msra.mxu2 %v484_v18  ;;  %237 = vmatpush.msra.mxu3 %v460_v10  ;;  %v564_v51 = vsub.f32 %v21_v34, %v546_v44  ;;  %v108_v55 = vand.u32 4294901760, %v107_v40  ;;  %v130_v56 = vand.u32 4294901760, %v549_v45  ;;  %v579_v57 = vsub.f32 %v20_v35, %v551_v46 }
   0xe   :  { %91 = vmatpush.msra.mxu1 %v90_v37  ;;  %51 = vmatpush.msra.mxu0 %v462_v11  ;;  %v581_v58 = vand.u32 4294901760, %v18_v48  ;;  %v125_v61 = vsub.f32 %v522_v33, %v124_v47  ;;  %vm35_vm0 = vcmask 982016   ;;  %v114_v62 = vand.u32 4294901760, %v113_v50 }
   0xf   :  { %190 = vmatpush.msra.mxu2 %v487_v19  ;;  %239 = vmatpush.msra.mxu3 %v462_v11  ;;  %v136_v63 = vand.u32 4294901760, %v564_v51  ;;  %v597_v0 = vsub.f32 %v19_v42, %v566_v52  ;;  %v599_v1 = vand.u32 4294901760, %v17_v54  ;;  %v120_v2 = vand.u32 4294901760, %v119_v53 }
  0x10   :  { %97 = vmatpush.msra.mxu1 %v96_v43  ;;  %53 = vmatpush.msra.mxu0 %v480_v17  ;;  %v601_v6 = vand.u32 4294901760, %v16_v59  ;;  %v37_v7 = vsel %vm35_vm0, %v15_v60, 0  ;;  %v131_v8 = vsub.f32 %v549_v45, %v130_v56  ;;  %v142_v12 = vand.u32 4294901760, %v579_v57 }
  0x11   :  { %193 = vmatpush.msra.mxu2 %v499_v25  ;;  %241 = vmatpush.msra.mxu3 %v480_v17  ;;  %v611_v13 = vsub.f32 %v18_v48, %v581_v58  ;;  %v613_v21 = vand.u32 4294901760, %v37_v7  ;;  %v126_v29 = vand.u32 4294901760, %v125_v61  ;;  %v137_v30 = vsub.f32 %v564_v51, %v136_v63 }
  0x12   :  { %103 = vmatpush.msra.mxu1 %v102_v49  ;;  %55 = vmatpush.msra.mxu0 %v489_v20  ;;  %v148_v31 = vand.u32 4294901760, %v597_v0  ;;  %v623_v34 = vsub.f32 %v17_v54, %v599_v1  ;;  %v132_v36 = vand.u32 4294901760, %v131_v8  ;;  %v143_v37 = vsub.f32 %v579_v57, %v142_v12 }
  0x13   :  { %196 = vmatpush.msra.mxu2 %v505_v28  ;;  %243 = vmatpush.msra.mxu3 %v489_v20  ;;  %v71_v35 = vsub.f32 %v37_v7, %v613_v21  ;;  %v154_v38 = vand.u32 4294901760, %v611_v13  ;;  %v634_v40 = vsub.f32 %v16_v59, %v601_v6  ;;  %v138_v42 = vand.u32 4294901760, %v137_v30 }
  0x14   :  { %109 = vmatpush.msra.mxu1 %v108_v55  ;;  %57 = vmatpush.msra.mxu0 %v518_v32  ;;  %v149_v43 = vsub.f32 %v597_v0, %v148_v31  ;;  %v160_v48 = vand.u32 4294901760, %v623_v34  ;;  %v144_v50 = vand.u32 4294901760, %v143_v37  ;;  %vm367_vm1 = vcmask 80896  }
  0x15   :  { %199 = vmatpush.msra.mxu2 %v522_v33  ;;  %245 = vmatpush.msra.mxu3 %v518_v32  ;;  %v72_v49 = vand.u32 4294901760, %v71_v35  ;;  %v155_v53 = vsub.f32 %v611_v13, %v154_v38  ;;  %v166_v54 = vand.u32 4294901760, %v634_v40 }
  0x16   :  { %115 = vmatpush.msra.mxu1 %v114_v62  ;;  %59 = vmatpush.msra.mxu0 %v546_v44  ;;  %v150_v55 = vand.u32 4294901760, %v149_v43  ;;  %v161_v59 = vsub.f32 %v623_v34, %v160_v48 }
  0x17   :  { %202 = vmatpush.msra.mxu2 %v549_v45  ;;  %247 = vmatpush.msra.mxu3 %v546_v44  ;;  %v73_v60 = vsub.f32 %v71_v35, %v72_v49  ;;  %v156_v61 = vand.u32 4294901760, %v155_v53  ;;  %v167_v62 = vsub.f32 %v634_v40, %v166_v54 }
  0x18   :  { %121 = vmatpush.msra.mxu1 %v120_v2  ;;  %61 = vmatpush.msra.mxu0 %v551_v46  ;;  %v162_v2 = vand.u32 4294901760, %v161_v59 }
  0x19   :  { %205 = vmatpush.msra.mxu2 %v564_v51  ;;  %249 = vmatpush.msra.mxu3 %v551_v46  ;;  %v74_v7 = vand.u32 4294901760, %v73_v60  ;;  %v168_v8 = vand.u32 4294901760, %v167_v62 }
  0x1a   :  { %127 = vmatpush.msra.mxu1 %v126_v29  ;;  %63 = vmatpush.msra.mxu0 %v566_v52 }
  0x1b   :  { %208 = vmatpush.msra.mxu2 %v579_v57  ;;  %251 = vmatpush.msra.mxu3 %v566_v52 }
  0x1c   :  { %133 = vmatpush.msra.mxu1 %v132_v36  ;;  %65 = vmatpush.msra.mxu0 %v581_v58 }
  0x1d   :  { %211 = vmatpush.msra.mxu2 %v597_v0  ;;  %253 = vmatpush.msra.mxu3 %v581_v58 }
  0x1e   :  { %139 = vmatpush.msra.mxu1 %v138_v42  ;;  %67 = vmatpush.msra.mxu0 %v599_v1 }
  0x1f   :  { %214 = vmatpush.msra.mxu2 %v611_v13  ;;  %255 = vmatpush.msra.mxu3 %v599_v1 }
  0x20   :  { %145 = vmatpush.msra.mxu1 %v144_v50  ;;  %69 = vmatpush.msra.mxu0 %v601_v6 }
  0x21   :  { %217 = vmatpush.msra.mxu2 %v623_v34  ;;  %257 = vmatpush.msra.mxu3 %v601_v6 }
  0x22   :  { %269 = vmatpush.msrb.mxu0 %v82_v22  ;;  %151 = vmatpush.msra.mxu1 %v150_v55 }
  0x23   :  { %220 = vmatpush.msra.mxu2 %v634_v40  ;;  %261 = vmatmul.f32.vlgmr.msra.gmra.mxu3 %v72_v49 }
  0x24   :  { %273 = vmatpush.msrb.mxu0 %v88_v23  ;;  %157 = vmatpush.msra.mxu1 %v156_v61 }
  0x25   :  { %223 = vmatmul.f32.vlgmr.msra.gmra.mxu2 %v71_v35  ;;  %75 = vmatmul.f32.vlgmr.msra.gmra.mxu0 %v74_v7 }
  0x26   :  { %277 = vmatpush.msrb.mxu0 %v94_v24  ;;  %163 = vmatpush.msra.mxu1 %v162_v2 }
  0x28   :  { %281 = vmatpush.msrb.mxu0 %v100_v26  ;;  %169 = vmatpush.msra.mxu1 %v168_v8 }
  0x29   :  { %171 = vmatmul.f32.vlgmr.msra.gmra.mxu1 %v613_v21 }
  0x2a   :  { %333 = vmatpush.msrb.mxu1 %v443_v3  ;;  %285 = vmatpush.msrb.mxu0 %v106_v27  ;;  %v386_v3 = vld [vmem:[%s713_s2] ss:$0 sm:$0xff] }
  0x2c   :  { %335 = vmatpush.msrb.mxu1 %v445_v4  ;;  %289 = vmatpush.msrb.mxu0 %v112_v39 }
  0x2e   :  { %337 = vmatpush.msrb.mxu1 %v447_v5  ;;  %293 = vmatpush.msrb.mxu0 %v118_v41 }
  0x30   :  { %339 = vmatpush.msrb.mxu1 %v458_v9  ;;  %297 = vmatpush.msrb.mxu0 %v124_v47 }
  0x32   :  { %341 = vmatpush.msrb.mxu1 %v460_v10  ;;  %301 = vmatpush.msrb.mxu0 %v130_v56 }
  0x34   :  { %343 = vmatpush.msrb.mxu1 %v462_v11  ;;  %305 = vmatpush.msrb.mxu0 %v136_v63 }
  0x36   :  { %345 = vmatpush.msrb.mxu1 %v480_v17  ;;  %309 = vmatpush.msrb.mxu0 %v142_v12 }
  0x38   :  { %347 = vmatpush.msrb.mxu1 %v489_v20  ;;  %313 = vmatpush.msrb.mxu0 %v148_v31 }
  0x3a   :  { %349 = vmatpush.msrb.mxu1 %v518_v32  ;;  %317 = vmatpush.msrb.mxu0 %v154_v38 }
  0x3c   :  { %351 = vmatpush.msrb.mxu1 %v546_v44  ;;  %321 = vmatpush.msrb.mxu0 %v160_v48 }
  0x3e   :  { %353 = vmatpush.msrb.mxu1 %v551_v46  ;;  %325 = vmatpush.msrb.mxu0 %v166_v54 }
  0x3f   :  { %327 = vmatmul.f32.vlgmr.msrb.gmra.mxu0 %v613_v21 }
  0x40   :  { %355 = vmatpush.msrb.mxu1 %v566_v52 }
  0x42   :  { %357 = vmatpush.msrb.mxu1 %v581_v58 }
  0x44   :  { %359 = vmatpush.msrb.mxu1 %v599_v1 }
  0x46   :  { %361 = vmatpush.msrb.mxu1 %v601_v6 }
  0x47   :  { %363 = vmatmul.f32.vlgmr.msrb.gmra.mxu1 %v613_v21 }
  0xa2   :  { %v76_v4 = vpop.f32.mrf.mxu0 }
  0xa3   :  { %v77_v5 = vadd.f32 %v386_v3, %v76_v4 }
  0xa6   :  { %v172_v9 = vpop.f32.mrf.mxu1  ;;  %v262_v15 = vpop.f32.mrf.mxu3 }
  0xa7   :  { %v173_v10 = vadd.f32 %v172_v9, %v77_v5 }
  0xa8   :  { %v224_v11 = vpop.f32.mrf.mxu2 }
  0xa9   :  { %v225_v14 = vadd.f32 %v224_v11, %v173_v10 }
  0xab   :  { %v263_v16 = vadd.f32 %v262_v15, %v225_v14 }
  0xbc   :  { %v328_v17 = vpop.f32.mrf.mxu0 }
  0xbd   :  { %v329_v18 = vadd.f32 %v328_v17, %v263_v16 }
  0xc4   :  { %v364_v19 = vpop.f32.mrf.mxu1 }
  0xc5   :  { %v365_v20 = vadd.f32 %v364_v19, %v329_v18 }
  0xc7   :  { %368 = vst.msk [vmem:[#allocation2] sm:$0xff] %vm367_vm1, %v365_v20 }
  0xc8   :  { %379 = dma.vmem_to_hbm [thread:$0]  %s375_s18, 128, %s377_s21, [#allocation3]  }
  0xc9   :  { %411 = dma.done.wait [#allocation3], 128  }
  0xca   :  { %412 = vsyncadd [#allocation3], 4294967168 }
  0xcb   :  { %384 = vsyncpa [#allocation3], 1 }

</bundles_post_ra>
